<compile_context>
chip_gen: v5e
topology: v5e:2x2
jax: 0.10.0
libtpu: 0.0.40
codegen_flags: <defaults>
</compile_context>

<pallas_src>
import functools

import jax
import jax.numpy as jnp
from jax.experimental import pallas as pl
from jax.experimental.pallas import tpu as pltpu

LANES = 128
SUBLANES = 8
MAX_TILE_ROWS = 8192   # 8192 x 128 x 4B = 4 MiB per f32 input block (x2 inputs x2 buffers = 16 MiB)


def _kl_bce_kernel(s_ref, t_ref, o_ref, *, inv_temp, steps_per_core, num_tiles,
                   mask_last, valid_rows_last):
    i = pl.program_id(1)                      # per-core step along the reduction axis
    tile_rows, lanes = s_ref.shape

    @pl.when(i == 0)
    def _():
        o_ref[...] = jnp.zeros_like(o_ref)    # (8, 128) f32 accumulator, VMEM-resident

    s = s_ref[...].astype(jnp.float32) * inv_temp
    t = t_ref[...].astype(jnp.float32) * inv_temp

    # teacher sigmoid via a single tanh (1 EUP push instead of exp + reciprocal)
    teacher_sig = 0.5 * jnp.tanh(0.5 * t) + 0.5
    # log sigmoid(s) = -softplus(-s) ; log(1 - sigmoid(s)) = -softplus(-s) - s
    softplus_neg = jnp.maximum(-s, 0.0) + jnp.log(1.0 + jnp.exp(-jnp.abs(s)))
    log_p = jnp.maximum(-softplus_neg, -100.0)            # PyTorch BCE -100 clamp
    log_1mp = jnp.maximum(-softplus_neg - s, -100.0)
    bce = -(log_1mp + teacher_sig * (log_p - log_1mp))    # == -(q*log_p + (1-q)*log_1mp)

    def fold(x):
        # Group rows by 8 (matches the native f32 (8,128) tile): layout-free reshape,
        # then pure-VPU vreg adds down to a single (8,128) vreg.
        return x.reshape(tile_rows // SUBLANES, SUBLANES, lanes).sum(axis=0)

    if mask_last:
        t_idx = pl.program_id(0) * steps_per_core + i

        @pl.when(t_idx < num_tiles - 1)
        def _():                              # steady state: no masking work at all
            o_ref[...] += fold(bce)

        @pl.when(t_idx == num_tiles - 1)
        def _():                              # last tile only: discard the overhang rows
            row_ids = jax.lax.broadcasted_iota(jnp.int32, (tile_rows, lanes), 0)
            # keep this a select (NOT multiply-by-mask) so NaN/Inf from the undefined
            # overhang region is discarded, never propagated into the accumulator.
            o_ref[...] += fold(jnp.where(row_ids < valid_rows_last, bce, 0.0))
    else:
        o_ref[...] += fold(bce)


def _bce_sum_jnp(s, t, inv_temp):
    """Plain-jnp BCE sum for the (<1024-element) ragged tail."""
    s = s.astype(jnp.float32) * inv_temp
    t = t.astype(jnp.float32) * inv_temp
    q = jax.nn.sigmoid(t)
    sp = jnp.maximum(-s, 0.0) + jnp.log1p(jnp.exp(-jnp.abs(s)))
    log_p = jnp.maximum(-sp, -100.0)
    log_1mp = jnp.maximum(-sp - s, -100.0)
    return -jnp.sum(log_1mp + q * (log_p - log_1mp))


def _num_tensorcores():
    """2 on multi-TensorCore chips (v4 / v5p megacore, v7x), else 1 (v2/v3/v5e/v6e)."""
    try:
        kind = jax.devices()[0].device_kind.lower()
    except Exception:
        return 1
    if any(tag in kind for tag in ("v4", "v5p", "v7", "7x")):
        return 2
    return 1


def klt_divergence(student_logits, teacher_logits, temperature=1.0, *,
                   max_tile_rows=MAX_TILE_ROWS):
    assert student_logits.shape == teacher_logits.shape
    n = int(student_logits.size)
    assert n > 0
    inv_temp = float(1.0 / temperature)
    scale = float(temperature) ** 2 / float(n)

    s_flat = jnp.ravel(student_logits)        # reshape of a contiguous array: free
    t_flat = jnp.ravel(teacher_logits)

    chunk = SUBLANES * LANES                  # 1024-element (8-row) alignment unit
    kernel_rows = (n // chunk) * SUBLANES     # rows streamed through the kernel (mult of 8)
    kernel_elems = kernel_rows * LANES
    tail_elems = n - kernel_elems             # < 1024

    tail_sum = jnp.float32(0.0)
    if tail_elems:
        # TODO(synk): when n is not a multiple of 1024 the prefix slice below may still
        # materialize one copy; a manual pl.ANY + make_async_copy ragged tail would avoid it.
        tail_sum = _bce_sum_jnp(s_flat[kernel_elems:], t_flat[kernel_elems:], inv_temp)

    if kernel_rows == 0:                      # whole input smaller than one chunk
        return tail_sum * scale

    if tail_elems:
        s2d = s_flat[:kernel_elems].reshape(kernel_rows, LANES)
        t2d = t_flat[:kernel_elems].reshape(kernel_rows, LANES)
    else:
        s2d = s_flat.reshape(kernel_rows, LANES)
        t2d = t_flat.reshape(kernel_rows, LANES)

    itemsize = min(jnp.dtype(s2d.dtype).itemsize, jnp.dtype(t2d.dtype).itemsize)
    row_align = max(SUBLANES, 32 // max(itemsize, 1))   # 8 f32, 16 bf16, 32 int8/fp8
    tile_rows = min(int(max_tile_rows), kernel_rows)
    if tile_rows < kernel_rows:               # multi-block: keep blocks dtype-tile aligned
        tile_rows = max(row_align, (tile_rows // row_align) * row_align)
        tile_rows = min(tile_rows, kernel_rows)
    num_tiles = -(-kernel_rows // tile_rows)
    mask_last = bool(kernel_rows % tile_rows)
    valid_rows_last = kernel_rows - (num_tiles - 1) * tile_rows

    # Split across TensorCores only where it helps: 2-TC chips, and an exact split so the
    # clamped / duplicated tile DMA of the previous version never happens.
    hw_cores = _num_tensorcores()
    num_cores = hw_cores if (hw_cores > 1 and num_tiles >= 2
                             and num_tiles % hw_cores == 0) else 1
    steps_per_core = num_tiles // num_cores

    kernel = functools.partial(
        _kl_bce_kernel,
        inv_temp=inv_temp,
        steps_per_core=int(steps_per_core),
        num_tiles=int(num_tiles),
        mask_last=mask_last,
        valid_rows_last=int(valid_rows_last),
    )

    def in_map(c, i):
        return (c * steps_per_core + i, 0)

    bytes_accessed = (kernel_elems * (jnp.dtype(s2d.dtype).itemsize
                                      + jnp.dtype(t2d.dtype).itemsize)
                      + num_cores * SUBLANES * LANES * 4)

    # TODO(synk): verify on v7x hardware that the leading "parallel" axis really shards the
    # grid across both TensorCores; if not, switch it to pltpu.CORE_PARALLEL / pl.core_map.
    partials = pl.pallas_call(
        kernel,
        out_shape=jax.ShapeDtypeStruct((num_cores * SUBLANES, LANES), jnp.float32),
        grid_spec=pltpu.PrefetchScalarGridSpec(
            num_scalar_prefetch=0,
            grid=(num_cores, steps_per_core),
            in_specs=[
                pl.BlockSpec((tile_rows, LANES), in_map),
                pl.BlockSpec((tile_rows, LANES), in_map),
            ],
            out_specs=pl.BlockSpec((SUBLANES, LANES), lambda c, i: (c, 0)),
        ),
        compiler_params=pltpu.CompilerParams(
            dimension_semantics=("parallel", "arbitrary"),
        ),
        cost_estimate=pl.CostEstimate(
            flops=10 * kernel_elems,
            transcendentals=3 * kernel_elems,
            bytes_accessed=int(bytes_accessed),
        ),
    )(s2d, t2d)

    return (jnp.sum(partials) + tail_sum) * scale


def _reference(student, teacher, temperature=1.0):
    s = student.astype(jnp.float32)
    t = teacher.astype(jnp.float32)
    ss = jax.nn.sigmoid(s / temperature)
    ts = jax.nn.sigmoid(t / temperature)
    log_p = jnp.maximum(jnp.log(ss), -100.0)
    log_1mp = jnp.maximum(jnp.log(1.0 - ss), -100.0)
    bce = -(ts * log_p + (1.0 - ts) * log_1mp)
    return (temperature ** 2) * jnp.mean(bce)


if __name__ == "__main__":
    key = jax.random.PRNGKey(0)
    k1, k2 = jax.random.split(key)

    # NCHW-like logits, small shapes (1024-aligned: everything streams through the kernel).
    student = jax.random.normal(k1, (2, 4, 16, 16), dtype=jnp.float32) * 2.0
    teacher = jax.random.normal(k2, (2, 4, 16, 16), dtype=jnp.float32) * 2.0
    temperature = 2.0
    loss = jax.block_until_ready(klt_divergence(student, teacher, temperature))
    ref = _reference(student, teacher, temperature)
    assert jnp.allclose(loss, ref, rtol=1e-5, atol=1e-5), (loss, ref)

    # Odd-sized bf16 case: exercises the dtype-preserving (half HBM traffic) path plus the
    # ragged jnp tail (<1024 elements).
    k3, k4 = jax.random.split(k2)
    s2 = (jax.random.normal(k3, (3, 5, 7, 11), dtype=jnp.float32) * 2.0).astype(jnp.bfloat16)
    t2 = (jax.random.normal(k4, (3, 5, 7, 11), dtype=jnp.float32) * 2.0).astype(jnp.bfloat16)
    loss2 = jax.block_until_ready(klt_divergence(s2, t2, 1.0))
    ref2 = _reference(s2, t2, 1.0)
    assert jnp.allclose(loss2, ref2, rtol=1e-4, atol=1e-4), (loss2, ref2)

    # Multi-tile case (small tile override): exercises the last-tile row mask and, on
    # 2-TensorCore chips, the exact 2-way core split.
    k5, k6 = jax.random.split(k4)
    s3 = jax.random.normal(k5, (2, 3, 100, 128), dtype=jnp.float32)
    t3 = jax.random.normal(k6, (2, 3, 100, 128), dtype=jnp.float32)
    loss3 = jax.block_until_ready(klt_divergence(s3, t3, 3.0, max_tile_rows=64))
    ref3 = _reference(s3, t3, 3.0)
    assert jnp.allclose(loss3, ref3, rtol=1e-4, atol=1e-5), (loss3, ref3)

    print("KERNEL_OK")
</pallas_src>

<mosaic_0001>
module attributes {stable_mosaic.version = 11 : i64} {
  func.func @_kl_bce_kernel(%arg0: i32, %arg1: i32, %arg2: memref<16x128xf32, #tpu.memory_space<vmem>>, %arg3: memref<16x128xf32, #tpu.memory_space<vmem>>, %arg4: memref<8x128xf32, #tpu.memory_space<vmem>>) attributes {dimension_semantics = [#tpu.dimension_semantics<parallel>, #tpu.dimension_semantics<arbitrary>], iteration_bounds = array<i64: 1, 1>, scalar_prefetch = 0 : i64, scratch_operands = 0 : i64, tpu.core_type = #tpu.core_type<tc>, window_params = [{transform_indices = @transform_0, window_bounds = array<i64: 16, 128>}, {transform_indices = @transform_1, window_bounds = array<i64: 16, 128>}, {transform_indices = @transform_2, window_bounds = array<i64: 8, 128>}]} {
    %c0_i32 = arith.constant 0 : i32
    %0 = arith.cmpi eq, %arg1, %c0_i32 : i32
    %1 = arith.extui %0 : i1 to i32
    %c0_i32_0 = arith.constant 0 : i32
    %2 = arith.cmpi ne, %1, %c0_i32_0 : i32
    scf.if %2 {
      %cst_22 = arith.constant 0.000000e+00 : f32
      %47 = vector.broadcast %cst_22 : f32 to vector<8x128xf32>
      %c0_23 = arith.constant 0 : index
      %c0_24 = arith.constant 0 : index
      %48 = vector.load %arg4[%c0_23, %c0_24] : memref<8x128xf32, #tpu.memory_space<vmem>>, vector<8x128xf32>
      tpu.vector_store %arg4[%c0_23, %c0_24], %47 {strides = array<i32>} : memref<8x128xf32, #tpu.memory_space<vmem>>, vector<8x128xf32>,
    } else {
    }
    %c0 = arith.constant 0 : index
    %c0_1 = arith.constant 0 : index
    %3 = vector.load %arg2[%c0, %c0_1] : memref<16x128xf32, #tpu.memory_space<vmem>>, vector<16x128xf32>
    %cst = arith.constant 5.000000e-01 : f32
    %4 = vector.broadcast %cst : f32 to vector<16x128xf32>
    %5 = arith.mulf %3, %4 : vector<16x128xf32>
    %c0_2 = arith.constant 0 : index
    %c0_3 = arith.constant 0 : index
    %6 = vector.load %arg3[%c0_2, %c0_3] : memref<16x128xf32, #tpu.memory_space<vmem>>, vector<16x128xf32>
    %cst_4 = arith.constant 5.000000e-01 : f32
    %7 = vector.broadcast %cst_4 : f32 to vector<16x128xf32>
    %8 = arith.mulf %6, %7 : vector<16x128xf32>
    %cst_5 = arith.constant 5.000000e-01 : f32
    %9 = vector.broadcast %cst_5 : f32 to vector<16x128xf32>
    %10 = arith.mulf %9, %8 : vector<16x128xf32>
    %11 = math.tanh %10 : vector<16x128xf32>
    %cst_6 = arith.constant 5.000000e-01 : f32
    %12 = vector.broadcast %cst_6 : f32 to vector<16x128xf32>
    %13 = arith.mulf %12, %11 : vector<16x128xf32>
    %cst_7 = arith.constant 5.000000e-01 : f32
    %14 = vector.broadcast %cst_7 : f32 to vector<16x128xf32>
    %15 = arith.addf %13, %14 : vector<16x128xf32>
    %cst_8 = arith.constant 0.000000e+00 : f32
    %16 = vector.broadcast %cst_8 : f32 to vector<16x128xf32>
    %17 = arith.subf %16, %5 : vector<16x128xf32>
    %cst_9 = arith.constant 0.000000e+00 : f32
    %18 = vector.broadcast %cst_9 : f32 to vector<16x128xf32>
    %19 = arith.maximumf %17, %18 : vector<16x128xf32>
    %20 = math.absf %5 : vector<16x128xf32>
    %cst_10 = arith.constant 0.000000e+00 : f32
    %21 = vector.broadcast %cst_10 : f32 to vector<16x128xf32>
    %22 = arith.subf %21, %20 : vector<16x128xf32>
    %23 = math.exp %22 : vector<16x128xf32>
    %cst_11 = arith.constant 1.000000e+00 : f32
    %24 = vector.broadcast %cst_11 : f32 to vector<16x128xf32>
    %25 = arith.addf %24, %23 : vector<16x128xf32>
    %26 = math.log %25 : vector<16x128xf32>
    %27 = arith.addf %19, %26 : vector<16x128xf32>
    %cst_12 = arith.constant 0.000000e+00 : f32
    %28 = vector.broadcast %cst_12 : f32 to vector<16x128xf32>
    %29 = arith.subf %28, %27 : vector<16x128xf32>
    %cst_13 = arith.constant -1.000000e+02 : f32
    %30 = vector.broadcast %cst_13 : f32 to vector<16x128xf32>
    %31 = arith.maximumf %29, %30 : vector<16x128xf32>
    %cst_14 = arith.constant 0.000000e+00 : f32
    %32 = vector.broadcast %cst_14 : f32 to vector<16x128xf32>
    %33 = arith.subf %32, %27 : vector<16x128xf32>
    %34 = arith.subf %33, %5 : vector<16x128xf32>
    %cst_15 = arith.constant -1.000000e+02 : f32
    %35 = vector.broadcast %cst_15 : f32 to vector<16x128xf32>
    %36 = arith.maximumf %34, %35 : vector<16x128xf32>
    %37 = arith.subf %31, %36 : vector<16x128xf32>
    %38 = arith.mulf %15, %37 : vector<16x128xf32>
    %39 = arith.addf %36, %38 : vector<16x128xf32>
    %cst_16 = arith.constant 0.000000e+00 : f32
    %40 = vector.broadcast %cst_16 : f32 to vector<16x128xf32>
    %41 = arith.subf %40, %39 : vector<16x128xf32>
    %c0_17 = arith.constant 0 : index
    %c0_18 = arith.constant 0 : index
    %42 = vector.load %arg4[%c0_17, %c0_18] : memref<8x128xf32, #tpu.memory_space<vmem>>, vector<8x128xf32>
    %43 = vector.shape_cast %41 : vector<16x128xf32> to vector<2x8x128xf32>
    %cst_19 = arith.constant dense<0.000000e+00> : vector<8x128xf32>
    %44 = vector.multi_reduction <add>, %43, %cst_19 [0] : vector<2x8x128xf32> to vector<8x128xf32>
    %45 = arith.addf %42, %44 : vector<8x128xf32>
    %c0_20 = arith.constant 0 : index
    %c0_21 = arith.constant 0 : index
    %46 = vector.load %arg4[%c0_20, %c0_21] : memref<8x128xf32, #tpu.memory_space<vmem>>, vector<8x128xf32>
    tpu.vector_store %arg4[%c0_20, %c0_21], %45 {strides = array<i32>} : memref<8x128xf32, #tpu.memory_space<vmem>>, vector<8x128xf32>,
    return
  }
  func.func @transform_0(%arg0: i32, %arg1: i32) -> (i32, i32) {
    %c1_i32 = arith.constant 1 : i32
    %0 = arith.muli %arg0, %c1_i32 : i32
    %1 = arith.addi %0, %arg1 : i32
    %c0_i32 = arith.constant 0 : i32
    %c0_i32_0 = arith.constant 0 : i32
    return %1, %c0_i32 : i32, i32
  }
  func.func @transform_1(%arg0: i32, %arg1: i32) -> (i32, i32) {
    %c1_i32 = arith.constant 1 : i32
    %0 = arith.muli %arg0, %c1_i32 : i32
    %1 = arith.addi %0, %arg1 : i32
    %c0_i32 = arith.constant 0 : i32
    %c0_i32_0 = arith.constant 0 : i32
    return %1, %c0_i32 : i32, i32
  }
  func.func @transform_2(%arg0: i32, %arg1: i32) -> (i32, i32) {
    %c0_i32 = arith.constant 0 : i32
    %c0_i32_0 = arith.constant 0 : i32
    return %arg0, %c0_i32 : i32, i32
  }
}

</mosaic_0001>

<bundles_post_ra>
// kernel: tpu_custom_call.1
= control target key start
LH: loop header
LB: loop body
LE: loop exit
PB: predicated region body
PF: predicated region fallthrough
CT: control target
= control target key end

     0   :  { %7 = vsyncpa [#allocation3], 0  ;;  %s260_s0 = inlined_call_operand.hbm [shape: f32[16,128], index: 0, kind: input, shape index: {}]   ;;  %s261_s1 = inlined_call_operand.hbm [shape: f32[16,128], index: 1, kind: input, shape index: {}]   ;;  %s262_s2 = inlined_call_operand.hbm [shape: f32[8,128], index: 2, kind: output, shape index: {}]  }
   0x1   :  { %8 = vsyncpa [#allocation6], 0 }
   0x2   :  { %9 = vsyncpa [#allocation4], 0  ;;  %s18_s11 = sshll.u32 %s260_s0, 4  ;;  %s231_s12 = smov [#allocation2]   ;;  %s19_s11 = int_to_ptr.hbm [resolvable:$true] %s18_s11 }
   0x3   :  { %s20_s13 = sshll.u32 %s231_s12, 4  ;;  %s35_s16 = sshll.u32 %s261_s1, 4  ;;  %s21_s13 = int_to_ptr.vmem [resolvable:$true] %s20_s13  ;;  %s36_s16 = int_to_ptr.hbm [resolvable:$true] %s35_s16 }
   0x4   :  { %s232_s17 = smov 128   ;;  %s233_s18 = smov 8  }
   0x5   :  { %26 = dma.hbm_to_vmem [thread:$0]  %s19_s11, 256, %s21_s13, [#allocation3], %s232_s17, %s232_s17, %s233_s18  }
   0x6   :  { %s234_s19 = smov [#allocation5]  }
   0x7   :  { %s37_s20 = sshll.u32 %s234_s19, 4  ;;  %s38_s20 = int_to_ptr.vmem [resolvable:$true] %s37_s20 }
   0x8   :  { %43 = dma.hbm_to_vmem [thread:$0]  %s36_s16, 256, %s38_s20, [#allocation6], %s232_s17, %s232_s17, %s233_s18  }
   0x9   :  { %225 = dma.done.wait [#allocation3], 256  }
   0xa   :  { %226 = vsyncadd [#allocation3], 4294967040 }
   0xb   :  { %227 = dma.done.wait [#allocation6], 256  }
   0xc   :  { %228 = vsyncadd [#allocation6], 4294967040  ;;  %v61_v0 = vld [vmem:[#allocation2] sm:$0xff]  ;;  %v62_v1 = vld [vmem:[#allocation2 + $0x8] sm:$0xff]  ;;  %s235_s0 = smov [#allocation7]   ;;  %s124_s23 = sshll.u32 %s262_s2, 4  ;;  %s125_s23 = int_to_ptr.hbm [resolvable:$true] %s124_s23 }
   0xd   :  { %v63_v2 = vmul.f32 0.5, %v61_v0  ;;  %v64_v3 = vmul.f32 0.5, %v62_v1  ;;  %v65_v10 = vld [vmem:[#allocation5] sm:$0xff]  ;;  %v66_v11 = vld [vmem:[#allocation5 + $0x8] sm:$0xff]  ;;  %s122_s1 = sshll.u32 %s235_s0, 4  ;;  %s123_s1 = int_to_ptr.vmem [resolvable:$true] %s122_s1 }
   0xe   :  { %v67_v12 = vmul.f32 0.5, %v65_v10  ;;  %v68_v13 = vmul.f32 0.5, %v66_v11 }
   0xf   :  { %v81_v4 = vand.u32 2147483647, %v63_v2  ;;  %v82_v5 = vand.u32 2147483647, %v64_v3  ;;  %v77_v20 = vsub.f32 0.0, %v63_v2  ;;  %v78_v21 = vsub.f32 0.0, %v64_v3 }
  0x10   :  { %v69_v16 = vmul.f32 0.5, %v67_v12  ;;  %v70_v18 = vmul.f32 0.5, %v68_v13 }
  0x11   :  { %v83_v6 = vsub.f32 0.0, %v81_v4  ;;  %v84_v7 = vsub.f32 0.0, %v82_v5  ;;  %v79_v22 = vmax.f32 %v77_v20, 0.0  ;;  %v80_v24 = vmax.f32 %v78_v21, 0.0 }
  0x13   :  { %v85_v8 = vmul.f32 1.442695, %v83_v6  ;;  %v87_v9 = vmul.f32 1.442695, %v84_v7 }
  0x15   :  { %141 = vpow2.f32 %v85_v8 }
  0x16   :  { %143 = vpow2.f32 %v87_v9 }
  0x1b   :  { %v142_v14 = vpop.eup %141 }
  0x1c   :  { %v144_v15 = vpop.eup %143  ;;  %v89_v17 = vadd.f32 1.0, %v142_v14 }
  0x1d   :  { %v90_v19 = vadd.f32 1.0, %v144_v15 }
  0x1e   :  { %145 = vlog2.f32 %v89_v17 }
  0x1f   :  { %147 = vlog2.f32 %v90_v19 }
  0x20   :  { %149 = vtanh.f32 %v69_v16 }
  0x21   :  { %151 = vtanh.f32 %v70_v18 }
  0x24   :  { %v146_v23 = vpop.eup %145 }
  0x25   :  { %v148_v25 = vpop.eup %147  ;;  %v92_v26 = vmul.f32 0.6931472, %v146_v23 }
  0x26   :  { %v150_v27 = vpop.eup %149  ;;  %v94_v28 = vmul.f32 0.6931472, %v148_v25 }
  0x27   :  { %v152_v29 = vpop.eup %151  ;;  %v95_v30 = vadd.f32 %v92_v26, %v79_v22  ;;  %v73_v32 = vmul.f32 0.5, %v150_v27 }
  0x28   :  { %v96_v31 = vadd.f32 %v94_v28, %v80_v24  ;;  %v74_v34 = vmul.f32 0.5, %v152_v29 }
  0x29   :  { %v97_v33 = vsub.f32 0.0, %v95_v30  ;;  %v75_v40 = vadd.f32 0.5, %v73_v32 }
  0x2a   :  { %v98_v35 = vsub.f32 0.0, %v96_v31  ;;  %v76_v42 = vadd.f32 0.5, %v74_v34 }
  0x2b   :  { %v99_v36 = vmax.f32 %v97_v33, -100.0  ;;  %v101_v37 = vsub.f32 %v97_v33, %v63_v2 }
  0x2c   :  { %v100_v38 = vmax.f32 %v98_v35, -100.0  ;;  %v102_v39 = vsub.f32 %v98_v35, %v64_v3 }
  0x2d   :  { %v103_v41 = vmax.f32 %v101_v37, -100.0 }
  0x2e   :  { %v104_v43 = vmax.f32 %v102_v39, -100.0 }
  0x2f   :  { %v105_v44 = vsub.f32 %v99_v36, %v103_v41 }
  0x30   :  { %v106_v45 = vsub.f32 %v100_v38, %v104_v43 }
  0x31   :  { %v107_v46 = vmul.f32 %v105_v44, %v75_v40 }
  0x32   :  { %v108_v47 = vmul.f32 %v106_v45, %v76_v42 }
  0x33   :  { %v109_v48 = vadd.f32 %v107_v46, %v103_v41 }
  0x34   :  { %v110_v49 = vadd.f32 %v108_v47, %v104_v43 }
  0x35   :  { %v111_v50 = vsub.f32 0.0, %v109_v48 }
  0x36   :  { %v112_v51 = vsub.f32 0.0, %v110_v49 }
  0x38   :  { %v114_v52 = vadd.f32 %v112_v51, %v111_v50 }
  0x3a   :  { %116 = vst [vmem:[#allocation7] sm:$0xff] %v114_v52 }
  0x3b   :  { %127 = dma.vmem_to_hbm [thread:$0]  %s123_s1, 128, %s125_s23, [#allocation4]  }
  0x3c   :  { %229 = dma.done.wait [#allocation4], 128  }
  0x3d   :  { %230 = vsyncadd [#allocation4], 4294967168 }
  0x3e   :  { %132 = vsyncpa [#allocation3], 1 }
  0x3f   :  { %133 = vsyncpa [#allocation6], 1 }
  0x40   :  { %134 = vsyncpa [#allocation4], 1 }

</bundles_post_ra>
